<compile_context>
chip_gen: v7x
topology: tpu7x:2x2x1
jax: 0.10.0
libtpu: 0.0.40
codegen_flags: <defaults>
</compile_context>

<pallas_src>
import jax
import jax.numpy as jnp
from jax.experimental import pallas as pl
from jax.experimental.pallas import tpu as pltpu


def _se_kernel(x_ref, w1t_ref, b1_ref, w2t_ref, b2_ref, o_ref):
    # x_ref block: (Bn, C, HW) -- channels on sublanes, spatial on lanes.
    hw = x_ref.shape[-1]

    # Squeeze: spatial mean via a cross-lane (XLU) reduction, accumulated in
    # f32.  No (HW, 1) ones constant, no 1-column MXU matmul.
    pooled = jnp.sum(x_ref[...].astype(jnp.float32), axis=-1) * (1.0 / hw)   # (Bn, C)

    # Excitation: two 1x1 convs == two small batched matmuls in f32.
    h = jnp.dot(pooled, w1t_ref[...],
                preferred_element_type=jnp.float32) + b1_ref[...]            # (Bn, Cse)
    h = h * jax.nn.sigmoid(h)                                                # swish
    g = jnp.dot(h, w2t_ref[...],
                preferred_element_type=jnp.float32) + b2_ref[...]            # (Bn, C)
    g = jax.nn.sigmoid(g)                                                    # gate

    # Scale: re-read x from the VMEM ref (keeps vreg pressure low for large
    # blocks), cast the gate once, broadcast over the lane (spatial) axis.
    o_ref[...] = x_ref[...] * g.astype(o_ref.dtype)[:, :, None]


def _pick_block_batch(n, per_n_bytes, target_bytes=2 << 20):
    """Largest divisor of n whose (Bn, C, HW) block stays <= target_bytes."""
    best = 1
    for d in range(1, n + 1):
        if n % d == 0 and d * per_n_bytes <= target_bytes:
            best = d
    return best


def se_forward(x_nchw, w1, b1, w2, b2, *, donate_x=False):
    """SE block forward (matches the PyTorch module).

    x_nchw: (N, C, H, W), f32 or bf16
    w1:     (Cse, C)  == PyTorch se1.weight squeezed from (Cse, C, 1, 1)
    b1:     (Cse,)    == PyTorch se1.bias
    w2:     (C, Cse)  == PyTorch se2.weight squeezed from (C, Cse, 1, 1)
    b2:     (C,)      == PyTorch se2.bias
    donate_x: alias x to the output (in-place SE usage; caller must not need x).
    returns (N, C, H, W) in x's dtype.
    """
    N, C, H, W = x_nchw.shape
    Cse = w1.shape[0]
    HW = H * W
    itemsize = jnp.dtype(x_nchw.dtype).itemsize

    # NCHW -> (N, C, H*W): a free reshape (spatial already contiguous);
    # HW lands on the 128-lane axis, channels on sublanes.
    x = x_nchw.reshape(N, C, HW)

    # Pre-transpose the tiny 1x1-conv weights once so in-kernel matmuls are
    # plain (Bn, C) @ (C, Cse) and (Bn, Cse) @ (Cse, C).  Keep params in f32.
    w1t = jnp.asarray(w1, jnp.float32).T              # (C, Cse)
    w2t = jnp.asarray(w2, jnp.float32).T              # (Cse, C)
    b1r = jnp.asarray(b1, jnp.float32).reshape(1, Cse)
    b2r = jnp.asarray(b2, jnp.float32).reshape(1, C)

    # Batch several batch-elements per grid step: target ~1-4 MiB blocks.
    per_n_bytes = C * HW * itemsize
    bn = _pick_block_batch(N, per_n_bytes)
    block_bytes = bn * per_n_bytes

    # VMEM budget: input + output blocks, each double-buffered, plus the tiny
    # weight/bias tiles and headroom.  Set explicitly (v5e default is 16 MiB).
    weight_bytes = (w1t.size + w2t.size + b1r.size + b2r.size) * 4
    needed = 4 * block_bytes + 4 * weight_bytes + (4 << 20)
    vmem_limit = int(max(needed, 32 << 20))

    out = pl.pallas_call(
        _se_kernel,
        out_shape=jax.ShapeDtypeStruct((N, C, HW), x.dtype),
        grid_spec=pltpu.PrefetchScalarGridSpec(
            num_scalar_prefetch=0,
            grid=(N // bn,),
            in_specs=[
                pl.BlockSpec((bn, C, HW), lambda g: (g, 0, 0)),
                pl.BlockSpec((C, Cse), lambda g: (0, 0)),
                pl.BlockSpec((1, Cse), lambda g: (0, 0)),
                pl.BlockSpec((Cse, C), lambda g: (0, 0)),
                pl.BlockSpec((1, C), lambda g: (0, 0)),
            ],
            out_specs=pl.BlockSpec((bn, C, HW), lambda g: (g, 0, 0)),
        ),
        compiler_params=pltpu.CompilerParams(
            dimension_semantics=("parallel",),     # shards batch groups across TCs
            vmem_limit_bytes=vmem_limit,
        ),
        # In-place SE: alias x with the output when the caller drops x.
        input_output_aliases={0: 0} if donate_x else {},
    )(x, w1t, b1r, w2t, b2r)

    # (N, C, HW) -> NCHW: again a free reshape.
    return out.reshape(N, C, H, W)


def _reference(x_nchw, w1, b1, w2, b2):
    x32 = x_nchw.astype(jnp.float32)
    pooled = jnp.mean(x32, axis=(2, 3))                       # (N, C)
    h = pooled @ w1.T + b1                                    # (N, Cse)
    h = h * jax.nn.sigmoid(h)
    g = jax.nn.sigmoid(h @ w2.T + b2)                         # (N, C)
    return x32 * g[:, :, None, None]


if __name__ == "__main__":
    key = jax.random.PRNGKey(0)
    k_x, k_w1, k_b1, k_w2, k_b2 = jax.random.split(key, 5)

    N, C, H, W = 2, 4, 16, 16
    Cse = 8

    x = jax.random.normal(k_x, (N, C, H, W), dtype=jnp.float32)
    # Synthetic parameters in PyTorch conv layout (1x1 kernels squeezed).
    w1 = jax.random.normal(k_w1, (Cse, C), dtype=jnp.float32) * 0.1
    b1 = jax.random.normal(k_b1, (Cse,), dtype=jnp.float32) * 0.1
    w2 = jax.random.normal(k_w2, (C, Cse), dtype=jnp.float32) * 0.1
    b2 = jax.random.normal(k_b2, (C,), dtype=jnp.float32) * 0.1

    ref = _reference(x, w1, b1, w2, b2)

    # f32 path.
    out = se_forward(x, w1, b1, w2, b2)
    jax.block_until_ready(out)
    assert out.shape == (N, C, H, W)
    assert jnp.allclose(out, ref, atol=1e-5, rtol=1e-5), "f32 mismatch vs reference"

    # bf16 I/O path (pool / excitation stay in f32 inside the kernel).
    out_bf16 = se_forward(x.astype(jnp.bfloat16), w1, b1, w2, b2)
    jax.block_until_ready(out_bf16)
    assert out_bf16.dtype == jnp.bfloat16
    assert jnp.allclose(out_bf16.astype(jnp.float32), ref, atol=5e-2, rtol=5e-2), \
        "bf16 mismatch vs reference"

    print("KERNEL_OK")
</pallas_src>

<mosaic_0001>
module attributes {stable_mosaic.version = 11 : i64} {
  func.func @_se_kernel(%arg0: i32, %arg1: memref<2x4x256xf32, #tpu.memory_space<vmem>>, %arg2: memref<4x8xf32, #tpu.memory_space<vmem>>, %arg3: memref<1x8xf32, #tpu.memory_space<vmem>>, %arg4: memref<8x4xf32, #tpu.memory_space<vmem>>, %arg5: memref<1x4xf32, #tpu.memory_space<vmem>>, %arg6: memref<2x4x256xf32, #tpu.memory_space<vmem>>) attributes {dimension_semantics = [#tpu.dimension_semantics<parallel>], iteration_bounds = array<i64: 1>, scalar_prefetch = 0 : i64, scratch_operands = 0 : i64, tpu.core_type = #tpu.core_type<tc>, window_params = [{transform_indices = @transform_0, window_bounds = array<i64: 2, 4, 256>}, {pipeline_mode = #tpu.pipeline_mode<synchronous>, transform_indices = @transform_1, window_bounds = array<i64: 4, 8>}, {pipeline_mode = #tpu.pipeline_mode<synchronous>, transform_indices = @transform_2, window_bounds = array<i64: 1, 8>}, {pipeline_mode = #tpu.pipeline_mode<synchronous>, transform_indices = @transform_3, window_bounds = array<i64: 8, 4>}, {pipeline_mode = #tpu.pipeline_mode<synchronous>, transform_indices = @transform_4, window_bounds = array<i64: 1, 4>}, {transform_indices = @transform_5, window_bounds = array<i64: 2, 4, 256>}]} {
    %c0 = arith.constant 0 : index
    %c0_0 = arith.constant 0 : index
    %c0_1 = arith.constant 0 : index
    %0 = vector.load %arg1[%c0, %c0_0, %c0_1] : memref<2x4x256xf32, #tpu.memory_space<vmem>>, vector<2x4x256xf32>
    %cst = arith.constant dense<0.000000e+00> : vector<2x4xf32>
    %1 = vector.multi_reduction <add>, %0, %cst [2] : vector<2x4x256xf32> to vector<2x4xf32>
    %cst_2 = arith.constant 3.906250e-03 : f32
    %2 = vector.broadcast %cst_2 : f32 to vector<2x4xf32>
    %3 = arith.mulf %1, %2 : vector<2x4xf32>
    %c0_3 = arith.constant 0 : index
    %c0_4 = arith.constant 0 : index
    %4 = vector.load %arg2[%c0_3, %c0_4] : memref<4x8xf32, #tpu.memory_space<vmem>>, vector<4x8xf32>
    %cst_5 = arith.constant dense<0.000000e+00> : vector<2x8xf32>
    %5 = tpu.matmul %3, %4, %cst_5 {dimension_numbers = #tpu.dot_dimension_numbers<[1], [0], [0], [1], [0, 0, 1, 1], [], []>} : vector<2x4xf32>, vector<4x8xf32>, vector<2x8xf32> -> vector<2x8xf32>
    %c0_6 = arith.constant 0 : index
    %c0_7 = arith.constant 0 : index
    %6 = vector.load %arg3[%c0_6, %c0_7] : memref<1x8xf32, #tpu.memory_space<vmem>>, vector<1x8xf32>
    %7 = vector.broadcast %6 : vector<1x8xf32> to vector<2x8xf32>
    %8 = arith.addf %5, %7 : vector<2x8xf32>
    %9 = arith.negf %8 : vector<2x8xf32>
    %10 = math.exp %9 : vector<2x8xf32>
    %cst_8 = arith.constant 1.000000e+00 : f32
    %11 = vector.broadcast %cst_8 : f32 to vector<2x8xf32>
    %12 = arith.addf %11, %10 : vector<2x8xf32>
    %13 = arith.divf %11, %12 : vector<2x8xf32>
    %14 = arith.mulf %8, %13 : vector<2x8xf32>
    %c0_9 = arith.constant 0 : index
    %c0_10 = arith.constant 0 : index
    %15 = vector.load %arg4[%c0_9, %c0_10] : memref<8x4xf32, #tpu.memory_space<vmem>>, vector<8x4xf32>
    %cst_11 = arith.constant dense<0.000000e+00> : vector<2x4xf32>
    %16 = tpu.matmul %14, %15, %cst_11 {dimension_numbers = #tpu.dot_dimension_numbers<[1], [0], [0], [1], [0, 0, 1, 1], [], []>} : vector<2x8xf32>, vector<8x4xf32>, vector<2x4xf32> -> vector<2x4xf32>
    %c0_12 = arith.constant 0 : index
    %c0_13 = arith.constant 0 : index
    %17 = vector.load %arg5[%c0_12, %c0_13] : memref<1x4xf32, #tpu.memory_space<vmem>>, vector<1x4xf32>
    %18 = vector.broadcast %17 : vector<1x4xf32> to vector<2x4xf32>
    %19 = arith.addf %16, %18 : vector<2x4xf32>
    %20 = arith.negf %19 : vector<2x4xf32>
    %21 = math.exp %20 : vector<2x4xf32>
    %cst_14 = arith.constant 1.000000e+00 : f32
    %22 = vector.broadcast %cst_14 : f32 to vector<2x4xf32>
    %23 = arith.addf %22, %21 : vector<2x4xf32>
    %24 = arith.divf %22, %23 : vector<2x4xf32>
    %c0_15 = arith.constant 0 : index
    %c0_16 = arith.constant 0 : index
    %c0_17 = arith.constant 0 : index
    %25 = vector.load %arg1[%c0_15, %c0_16, %c0_17] : memref<2x4x256xf32, #tpu.memory_space<vmem>>, vector<2x4x256xf32>
    %26 = vector.shape_cast %24 : vector<2x4xf32> to vector<2x4x1xf32>
    %27 = vector.broadcast %26 : vector<2x4x1xf32> to vector<2x4x256xf32>
    %28 = arith.mulf %25, %27 : vector<2x4x256xf32>
    %c0_18 = arith.constant 0 : index
    %c0_19 = arith.constant 0 : index
    %c0_20 = arith.constant 0 : index
    %29 = vector.load %arg6[%c0_18, %c0_19, %c0_20] : memref<2x4x256xf32, #tpu.memory_space<vmem>>, vector<2x4x256xf32>
    tpu.vector_store %arg6[%c0_18, %c0_19, %c0_20], %28 {strides = array<i32>} : memref<2x4x256xf32, #tpu.memory_space<vmem>>, vector<2x4x256xf32>,
    return
  }
  func.func @transform_0(%arg0: i32) -> (i32, i32, i32) {
    %c0_i32 = arith.constant 0 : i32
    %c0_i32_0 = arith.constant 0 : i32
    %c0_i32_1 = arith.constant 0 : i32
    return %arg0, %c0_i32, %c0_i32_0 : i32, i32, i32
  }
  func.func @transform_1(%arg0: i32) -> (i32, i32) {
    %c0_i32 = arith.constant 0 : i32
    %c0_i32_0 = arith.constant 0 : i32
    %c0_i32_1 = arith.constant 0 : i32
    return %c0_i32, %c0_i32_0 : i32, i32
  }
  func.func @transform_2(%arg0: i32) -> (i32, i32) {
    %c0_i32 = arith.constant 0 : i32
    %c0_i32_0 = arith.constant 0 : i32
    %c0_i32_1 = arith.constant 0 : i32
    return %c0_i32, %c0_i32_0 : i32, i32
  }
  func.func @transform_3(%arg0: i32) -> (i32, i32) {
    %c0_i32 = arith.constant 0 : i32
    %c0_i32_0 = arith.constant 0 : i32
    %c0_i32_1 = arith.constant 0 : i32
    return %c0_i32, %c0_i32_0 : i32, i32
  }
  func.func @transform_4(%arg0: i32) -> (i32, i32) {
    %c0_i32 = arith.constant 0 : i32
    %c0_i32_0 = arith.constant 0 : i32
    %c0_i32_1 = arith.constant 0 : i32
    return %c0_i32, %c0_i32_0 : i32, i32
  }
  func.func @transform_5(%arg0: i32) -> (i32, i32, i32) {
    %c0_i32 = arith.constant 0 : i32
    %c0_i32_0 = arith.constant 0 : i32
    %c0_i32_1 = arith.constant 0 : i32
    return %arg0, %c0_i32, %c0_i32_0 : i32, i32, i32
  }
}

</mosaic_0001>

<bundles_post_ra>
// kernel: tpu_custom_call.1
= control target key start
LH: loop header
LB: loop body
LE: loop exit
PB: predicated region body
PF: predicated region fallthrough
CT: control target
= control target key end

     0   :  { %10 = vsyncpa [#allocation3], 0  ;;  %s484_s0 = inlined_call_operand.hbm [shape: f32[2,4,256], index: 0, kind: input, shape index: {}]   ;;  %s485_s1 = inlined_call_operand.vmem [shape: f32[4,8], index: 1, kind: input, shape index: {}]   ;;  %s486_s2 = inlined_call_operand.vmem [shape: f32[1,8], index: 2, kind: input, shape index: {}]   ;;  %s487_s3 = inlined_call_operand.vmem [shape: f32[8,4], index: 3, kind: input, shape index: {}]   ;;  %s488_s4 = inlined_call_operand.vmem [shape: f32[1,4], index: 4, kind: input, shape index: {}]   ;;  %s489_s5 = inlined_call_operand.hbm [shape: f32[2,4,256], index: 5, kind: output, shape index: {}]  }
   0x1   :  { %11 = vsyncpa [#allocation4], 0  ;;  %s388_s18 = smov [#allocation2]   ;;  %s340_s22 = scalar_lea.hbm %s484_s0, 256 }
   0x2   :  { %s17_s19 = sshll.u32 %s388_s18, 4  ;;  %p341_p0 = scmp.ne.s32.totalorder %s484_s0, %s340_s22  ;;  %s18_s19 = int_to_ptr.vmem [resolvable:$true] %s17_s19 }
   0x3   :  { %p344_p1 = scmp.lt.u32.totalorder %s340_s22, %s484_s0 }
   0x5   :  { %p346_p2 = pnand %p344_p1, %p341_p0 }
   0x7   :  { %349 = shalt.err (!%p346_p2)
}
   0x8   :  { %s350_s27 = scalar_lea.vmem %s18_s19, 256  ;;  %p355_p4 = scmp.lt.s32.totalorder %s18_s19, %s18_s19 }
   0x9   :  { %p351_p3 = scmp.ne.s32.totalorder %s18_s19, %s350_s27  ;;  %p356_p5 = scmp.lt.s32.totalorder %s350_s27, %s350_s27 }
   0xb   :  { %p357_p6 = por %p356_p5, %p355_p4 }
   0xd   :  { %p358_p7 = pnand %p357_p6, %p351_p3 }
   0xf   :  { %361 = shalt.err (!%p358_p7)
}
  0x10   :  { %s389_s28 = smov 128   ;;  %s390_s29 = smov 8  }
  0x11   :  { %23 = dma.hbm_to_vmem [thread:$0]  %s484_s0, 256, %s18_s19, [#allocation3], %s389_s28, %s389_s28, %s390_s29  }
  0x12   :  { %384 = dma.done.wait [#allocation3], 256  }
  0x13   :  { %385 = vsyncadd [#allocation3], 4294967040  ;;  %vm43_vm0 = vcmask 1043456   ;;  %v440_v0 = vld [vmem:[#allocation2] sm:$0xff]  ;;  %v442_v1 = vld [vmem:[#allocation2 + $0x8] sm:$0xff]  ;;  %v391_v11 = vmov 0.0   ;;  %v66_v12 = vlaneseq }
  0x14   :  { %v39_v2 = vcombine.high %v440_v0, %v440_v0  ;;  %v44_v3 = vsel %vm43_vm0, %v440_v0, 0.0  ;;  %v40_v4 = vcombine.high %v442_v1, %v442_v1  ;;  %v49_v6 = vsel %vm43_vm0, %v442_v1, 0.0  ;;  %v56_v10 = vld [vmem:[%s485_s1] sm:$0xf]  ;;  %313 = vmatprep.subr.mxu0 %v391_v11  ;;  %318 = vmatprep.subr.mxu1 %v391_v11 }
  0x15   :  { %vm392_vm1 = vmmov 0   ;;  %314 = vmatpush3.msk.msra.mxu0 %vm43_vm0, %v56_v10  ;;  %v67_v13 = vand.u32 127, %v66_v12  ;;  %v69_v14 = vshrl.u32 %v66_v12, 7  ;;  %vm76_vm2 = vcmask 1041409   ;;  %v161_v23 = vld [vmem:[%s487_s3] sm:$0xff] }
  0x16   :  { %v45_v5 = vsel %vm43_vm0, %v39_v2, 0.0  ;;  %v50_v7 = vsel %vm43_vm0, %v40_v4, 0.0  ;;  %315 = vmatprep.mubr.msk.f32.mxu0 %vm392_vm1, %v391_v11  ;;  %320 = vmatprep.mubr.msk.f32.mxu1 %vm392_vm1, %v391_v11  ;;  %vm78_vm3 = vcmask 31744   ;;  %v302_v24 = vld [vmem:[%s486_s2] ss:$0 sm:$0xff]  ;;  %vm169_vm4 = vcmask 64512  }
  0x17   :  { %v46_v8 = vadd.f32 %v45_v5, %v44_v3  ;;  %v51_v9 = vadd.f32 %v50_v7, %v49_v6  ;;  %v70_v16 = vsub.s32 %v67_v13, %v69_v14  ;;  %319 = vmatpush3.msra.mxu1 %v161_v23  ;;  %v306_v33 = vld [vmem:[%s488_s4] ss:$0 sm:$0xff]  ;;  %v251_v40 = vsub.s32 0, %v69_v14  ;;  %s394_s2 = smov [#allocation5]  }
  0x18   :  { %v258_v43 = vsub.s32 1, %v69_v14  ;;  %v393_v45 = vmov 839922192   ;;  %s290_s3 = sshll.u32 %s394_s2, 4  ;;  %s291_s3 = int_to_ptr.vmem [resolvable:$true] %s290_s3 }
  0x19   :  { %47 = vadd.xlane.f32.xlu0 %v46_v8  ;;  %v266_v46 = vunpack.c.l.s4 %v393_v45  ;;  %s362_s4 = scalar_lea.vmem %s291_s3, 256  ;;  %p367_p9 = scmp.lt.s32.totalorder %s291_s3, %s291_s3 }
  0x1a   :  { %p363_p8 = scmp.ne.s32.totalorder %s291_s3, %s362_s4  ;;  %p368_p10 = scmp.lt.s32.totalorder %s362_s4, %s362_s4 }
  0x1b   :  { %v267_v47 = vunpack.c.0.s8 %v266_v46 }
  0x1c   :  { %p369_p11 = por %p368_p10, %p367_p9 }
  0x1d   :  { %52 = vadd.xlane.f32.xlu0 %v51_v9  ;;  %v270_v48 = vsub.s32 %v267_v47, %v69_v14 }
  0x1e   :  { %p370_p12 = pnand %p369_p11, %p363_p8 }
  0xa6   :  { %v48_v15 = vpop.xlane.xlu0 %47 }
  0xa7   :  { %v54_v17 = vmul.f32 0.00390625, %v48_v15 }
  0xa9   :  { %v71_v20 = vrot.slane %v54_v17, %v70_v16 }
  0xaa   :  { %v53_v18 = vpop.xlane.xlu0 %52 }
  0xab   :  { %v55_v19 = vmul.f32 0.00390625, %v53_v18 }
  0xad   :  { %v75_v21 = vrot.slane %v55_v19, %v70_v16 }
  0xaf   :  { %v77_v22 = vsel %vm76_vm2, %v75_v21, %v71_v20 }
  0xb0   :  { %316 = vmatmul.mubr.msk.f32.vlgmr.msra.gmra.mrb[0].mxu0 %vm78_vm3, %v77_v22 }
 0x183   :  { %v150_v25 = vpop.f32.mrb[0].mxu0 }
 0x184   :  { %v151_v26 = vadd.f32 %v302_v24, %v150_v25  ;;  %v317_v27 = vpop.f32.mrb[1].mxu0 }
 0x186   :  { %v305_v28 = vmul.f32 -1.442695, %v151_v26 }
 0x188   :  { %332 = vpow2.f32 %v305_v28 }
 0x192   :  { %v333_v29 = vpop.eup %332 }
 0x193   :  { %v157_v30 = vadd.f32 1.0, %v333_v29 }
 0x195   :  { %334 = vrcp.f32 %v157_v30 }
 0x19f   :  { %v335_v31 = vpop.eup %334 }
 0x1a0   :  { %v160_v32 = vmul.f32 %v335_v31, %v151_v26 }
 0x1a2   :  { %321 = vmatmul.mubr.msk.f32.vlgmr.msra.gmra.mrb[0].mxu1 %vm169_vm4, %v160_v32 }
 0x275   :  { %v239_v34 = vpop.f32.mrb[0].mxu1 }
 0x276   :  { %v240_v35 = vadd.f32 %v306_v33, %v239_v34  ;;  %v322_v36 = vpop.f32.mrb[1].mxu1 }
 0x278   :  { %v308_v37 = vmul.f32 -1.442695, %v240_v35 }
 0x27a   :  { %336 = vpow2.f32 %v308_v37 }
 0x284   :  { %v337_v38 = vpop.eup %336 }
 0x285   :  { %v246_v39 = vadd.f32 1.0, %v337_v38 }
 0x287   :  { %338 = vrcp.f32 %v246_v39 }
 0x291   :  { %v339_v41 = vpop.eup %338 }
 0x292   :  { %v252_v42 = vrot.slane %v339_v41, %v251_v40  ;;  %v259_v44 = vrot.slane %v339_v41, %v258_v43 }
 0x294   :  { %254 = vbcast.lane.b32.xlu1 %v252_v42, 256 }
 0x298   :  { %261 = vbcast.lane.b32.xlu1 %v259_v44, 256 }
 0x306   :  { %v255_v49 = vpop.permute.xlu1 %254 }
 0x307   :  { %v271_v50 = vrot.slane %v255_v49, %v270_v48 }
 0x309   :  { %v281_v51 = vmul.f32 %v271_v50, %v440_v0 }
 0x30a   :  { %v262_v52 = vpop.permute.xlu1 %261 }
 0x30b   :  { %283 = vst [vmem:[#allocation5] sm:$0xff] %v281_v51  ;;  %v278_v53 = vrot.slane %v262_v52, %v270_v48 }
 0x30d   :  { %v282_v54 = vmul.f32 %v278_v53, %v442_v1 }
 0x30f   :  { %284 = vst [vmem:[#allocation5 + $0x8] sm:$0xff] %v282_v54 }
 0x310   :  { %373 = shalt.err (!%p370_p12)
}
 0x311   :  { %s374_s15 = scalar_lea.hbm %s489_s5, 256 }
 0x312   :  { %p375_p13 = scmp.ne.s32.totalorder %s489_s5, %s374_s15  ;;  %p378_p0 = scmp.lt.u32.totalorder %s374_s15, %s489_s5 }
 0x314   :  { %p380_p1 = pnand %p378_p0, %p375_p13 }
 0x316   :  { %383 = shalt.err (!%p380_p1)
}
 0x317   :  { %296 = dma.vmem_to_hbm [thread:$0]  %s291_s3, 256, %s489_s5, [#allocation4], %s389_s28, %s389_s28, %s390_s29  }
 0x318   :  { %386 = dma.done.wait [#allocation4], 256  }
 0x319   :  { %387 = vsyncadd [#allocation4], 4294967040 }
 0x31a   :  { %300 = vsyncpa [#allocation3], 1 }
 0x31b   :  { %301 = vsyncpa [#allocation4], 1 }

</bundles_post_ra>
